<compile_context>
chip_gen: v5e
topology: v5e:2x2
jax: 0.10.0
libtpu: 0.0.40
codegen_flags: <defaults>
</compile_context>

<pallas_src>
import numpy as np
import jax
import jax.numpy as jnp
from jax.experimental import pallas as pl
from jax.experimental.pallas import tpu as pltpu


# ---------------------------------------------------------------------------
# Deterministic parameter construction (mirrors HarmonicLayer.__init__)
# ---------------------------------------------------------------------------
def create_harmonic_matrix(size, sample_rate=22050, n_mels=128):
    def hz_to_mel(f):
        return 2595.0 * np.log10(1.0 + f / 700.0)

    min_mel = hz_to_mel(20.0)
    max_mel = hz_to_mel(sample_rate / 2.0)
    mels = np.linspace(min_mel, max_mel, n_mels)
    freqs = 700.0 * (10.0 ** (mels / 2595.0) - 1.0)
    f = freqs[:size]
    ratio = f[:, None] / f[None, :]
    ratio = np.where(ratio > 1.0, 1.0 / ratio, ratio)
    consonance_scores = {1.0: 1.0, 0.667: 0.9, 0.75: 0.8, 0.8: 0.7,
                         0.833: 0.6, 0.889: 0.5, 0.944: 0.3}
    mat = np.zeros_like(ratio)
    for r, w in consonance_scores.items():
        sigma = 0.01 if r == 1.0 else 0.02
        mat += w * np.exp(-((ratio - r) ** 2) / sigma)
    np.fill_diagonal(mat, 1.0)
    return (mat / mat.max()).astype(np.float32)


def create_masking_matrix(size, n_mels=128, is_mel_scale=True):
    cb = max(1, int((n_mels if is_mel_scale else size) * 0.05))
    idx = np.arange(size)
    d = idx[None, :] - idx[:, None]           # d[i, j] = j - i
    in_band = np.abs(d) <= cb
    val = np.where(d <= 0,
                   np.exp(-0.5 * (d / cb) ** 2),
                   np.exp(-1.0 * (d / cb) ** 2))
    masking = np.where(in_band, val, 0.0)
    return (masking / masking.max()).astype(np.float32)


# ---------------------------------------------------------------------------
# Small helpers
# ---------------------------------------------------------------------------
def _round_up(n, m):
    return ((n + m - 1) // m) * m


def _largest_div_multiple(total, mult, cap):
    """Largest d <= cap with d % mult == 0 and total % d == 0, else None."""
    cap = min(cap, total)
    d = (cap // mult) * mult
    while d >= mult:
        if total % d == 0:
            return d
        d -= mult
    return None


def _choose_bn(out_f, target=512):
    """Lane-dense output-column tile: 128-multiple, <= target, prefer divisors."""
    if out_f <= target:
        return out_f
    cand = _largest_div_multiple(out_f, 128, target)
    return cand if cand is not None else target   # non-divisor -> cdiv grid


def _vmem_budget_bytes():
    """~70% of physical per-core VMEM (64 MiB v7x, 128 MiB v5e/v6e)."""
    try:
        phys = int(pltpu.get_tpu_info().vmem_capacity_bytes)
    except Exception:
        phys = 64 * 1024 * 1024                   # conservative (v7x per-TC)
    return min(int(phys * 0.7), 112 * 1024 * 1024)


def _footprint_bytes(bm, bn, bk, isz, out_isz, ktiled):
    """Per-step VMEM estimate: double-buffered x, W, M, bias, out (+ scratch)."""
    buf = 2 * (bm * bk * isz + 2 * bk * bn * isz + bn * 4 + bm * bn * out_isz)
    if ktiled:
        buf += 2 * bm * bn * 4                    # f32 accumulators
    return buf


# ---------------------------------------------------------------------------
# Kernels
# ---------------------------------------------------------------------------
def _harmonic_kernel(x_ref, w_ref, m_ref, b_ref, o_ref):
    """Single K block: out = (x @ W_eff + b) * (1 - |x| @ M_scaled)."""
    x = x_ref[...]                                              # (bm, in_f)
    lin = jnp.dot(x, w_ref[...], preferred_element_type=jnp.float32) + b_ref[...]
    mask = jnp.dot(jnp.abs(x), m_ref[...], preferred_element_type=jnp.float32)
    o_ref[...] = (lin * (1.0 - mask)).astype(o_ref.dtype)


def _harmonic_kernel_ktiled(x_ref, w_ref, m_ref, b_ref, o_ref,
                            lin_acc, mask_acc):
    """K-tiled variant with f32 VMEM accumulators (grid = (cols, batch, k))."""
    k = pl.program_id(2)

    @pl.when(k == 0)
    def _():
        lin_acc[...] = jnp.zeros_like(lin_acc)
        mask_acc[...] = jnp.zeros_like(mask_acc)

    x = x_ref[...]                                              # (bm, bk)
    lin_acc[...] += jnp.dot(x, w_ref[...], preferred_element_type=jnp.float32)
    mask_acc[...] += jnp.dot(jnp.abs(x), m_ref[...],
                             preferred_element_type=jnp.float32)

    @pl.when(k == pl.num_programs(2) - 1)
    def _():
        o_ref[...] = ((lin_acc[...] + b_ref[...])
                      * (1.0 - mask_acc[...])).astype(o_ref.dtype)


# ---------------------------------------------------------------------------
# One-time parameter fold (cache the result; do NOT re-run every forward)
# ---------------------------------------------------------------------------
def precompute_harmonic_params(weight, bias, harmonic_matrix, masking_matrix,
                               harmonic_weight, *, compute_dtype=jnp.bfloat16):
    """Fold linear + harmonic terms: W_eff = (I + hw*H) @ W.T, M_scaled = 0.2*M.

    Run once at parameter-load time; the returned tuple feeds
    `harmonic_layer_apply` directly on every forward call.
    """
    f32 = jnp.float32
    in_f = weight.shape[1]
    hw = jnp.asarray(harmonic_weight, f32)
    a_eff = jnp.eye(in_f, dtype=f32) + hw * harmonic_matrix.astype(f32)
    # Contract on weight's last axis (== (I + hw*H) @ W.T, without forming W.T)
    w_eff = jax.lax.dot_general(a_eff, weight.astype(f32),
                                dimension_numbers=(((1,), (1,)), ((), ())))
    m_scaled = 0.2 * masking_matrix.astype(f32)
    return (w_eff.astype(compute_dtype),
            m_scaled.astype(compute_dtype),
            bias.astype(f32).reshape(1, -1))


# ---------------------------------------------------------------------------
# Pallas forward pass on pre-folded parameters
# ---------------------------------------------------------------------------
def harmonic_layer_apply(x, w_eff, m_scaled, bias2d, *, bm=None, bn=None,
                         bk=None):
    in_f, out_f = w_eff.shape
    if in_f != out_f:
        raise ValueError(
            "HarmonicLayer requires in_features == out_features: the masking "
            "term is (B, in) and multiplies the (B, out) output elementwise.")
    if m_scaled.shape != (in_f, out_f) or bias2d.shape != (1, out_f):
        raise ValueError("precomputed parameter shapes are inconsistent")

    lead = x.shape[:-1]
    x2 = x.reshape(-1, in_f)
    B = x2.shape[0]
    out_dtype = x.dtype

    compute_dtype = w_eff.dtype
    isz = jnp.dtype(compute_dtype).itemsize
    out_isz = jnp.dtype(out_dtype).itemsize
    xc = x2.astype(compute_dtype)

    # ---- Tile selection ----------------------------------------------------
    if bm is None:
        cap = 1024                                  # amortize per-step overhead
        while cap > 8 and cap * in_f * isz > (2 << 20):
            cap //= 2                               # keep x tile <= ~2 MiB
        bm = min(cap, _round_up(B, 8))
    bm = max(8, _round_up(min(bm, _round_up(B, 8)), 8))

    if bn is None:
        bn = _choose_bn(out_f)

    if bk is None:
        bk = in_f
    if in_f % bk != 0:
        raise ValueError("bk must divide in_features (OOB K reads would "
                         "corrupt valid outputs)")

    budget = _vmem_budget_bytes()

    def _fits(bm_, bn_, bk_):
        return _footprint_bytes(bm_, bn_, bk_, isz, out_isz,
                                bk_ < in_f) <= budget

    # Shrink tiles until the double-buffered footprint fits physical VMEM.
    while not _fits(bm, bn, bk):
        if in_f % 128 == 0 and bk > 128:
            cand = _largest_div_multiple(in_f, 128, bk // 2)
            if cand is not None and cand < bk:
                bk = cand
                continue
        if bn > 128:
            bn = max(128, (bn // 2) // 128 * 128)
            continue
        if bm > 8:
            bm = max(8, (bm // 2) // 8 * 8)
            continue
        break

    n_i = pl.cdiv(B, bm)           # batch tiles  (inner / fast grid axis)
    n_j = pl.cdiv(out_f, bn)       # column tiles (outer / slow grid axis)

    # v7x megacore: make sure at least one "parallel" axis has >= 2 tiles so
    # the second TensorCore is used (no-op on single-core v5e/v6e).
    if n_i * n_j == 1 and B >= 16:
        bm = max(8, _round_up(-(-B // 2), 8))
        n_i = pl.cdiv(B, bm)

    n_k = pl.cdiv(in_f, bk)
    ktiled = n_k > 1

    est = _footprint_bytes(bm, bn, bk, isz, out_isz, ktiled)
    vmem_limit = None
    if est > 12 * 1024 * 1024:     # above v5e's default scoped limit
        vmem_limit = min(int(est * 1.4), budget)

    # ---- pallas_call ---------------------------------------------------------
    # Weight-stationary order: columns (j) outer, batch (i) inner -> W_eff / M
    # column tiles are fetched from HBM once and stay resident across the
    # whole batch sweep; only the small x tile is re-streamed.
    if not ktiled:
        grid = (n_j, n_i)
        kernel = _harmonic_kernel
        in_specs = [
            pl.BlockSpec((bm, in_f), lambda j, i: (i, 0)),    # x batch tile
            pl.BlockSpec((in_f, bn), lambda j, i: (0, j)),    # W_eff col tile
            pl.BlockSpec((in_f, bn), lambda j, i: (0, j)),    # M_scaled col tile
            pl.BlockSpec((1, bn), lambda j, i: (0, j)),       # bias col tile
        ]
        out_specs = pl.BlockSpec((bm, bn), lambda j, i: (i, j))
        scratch = []
        dims = ("parallel", "parallel")
    else:
        grid = (n_j, n_i, n_k)
        kernel = _harmonic_kernel_ktiled
        in_specs = [
            pl.BlockSpec((bm, bk), lambda j, i, k: (i, k)),
            pl.BlockSpec((bk, bn), lambda j, i, k: (k, j)),
            pl.BlockSpec((bk, bn), lambda j, i, k: (k, j)),
            pl.BlockSpec((1, bn), lambda j, i, k: (0, j)),
        ]
        out_specs = pl.BlockSpec((bm, bn), lambda j, i, k: (i, j))
        scratch = [pltpu.VMEM((bm, bn), jnp.float32),
                   pltpu.VMEM((bm, bn), jnp.float32)]
        dims = ("parallel", "parallel", "arbitrary")

    out = pl.pallas_call(
        kernel,
        out_shape=jax.ShapeDtypeStruct((B, out_f), out_dtype),
        grid=grid,
        in_specs=in_specs,
        out_specs=out_specs,
        scratch_shapes=scratch,
        compiler_params=pltpu.CompilerParams(
            dimension_semantics=dims,
            vmem_limit_bytes=vmem_limit),
    )(xc, w_eff, m_scaled, bias2d)

    return out.reshape(*lead, out_f)


def harmonic_layer_forward(x, weight, bias, harmonic_matrix, masking_matrix,
                           harmonic_weight, *, compute_dtype=jnp.bfloat16,
                           bm=None, bn=None, bk=None):
    """Convenience wrapper. For inference, call precompute_harmonic_params once
    and reuse its result with harmonic_layer_apply instead."""
    params = precompute_harmonic_params(weight, bias, harmonic_matrix,
                                        masking_matrix, harmonic_weight,
                                        compute_dtype=compute_dtype)
    return harmonic_layer_apply(x, *params, bm=bm, bn=bn, bk=bk)


# ---------------------------------------------------------------------------
if __name__ == "__main__":
    # in_features == out_features == n_mels (required by the module's math).
    B, in_f, out_f, n_mels, sample_rate = 8, 128, 128, 128, 22050

    key = jax.random.PRNGKey(0)
    k_w, k_b, k_x = jax.random.split(key, 3)
    bound = 1.0 / np.sqrt(in_f)
    weight = jax.random.uniform(k_w, (out_f, in_f), jnp.float32, -bound, bound)
    bias = jax.random.uniform(k_b, (out_f,), jnp.float32, -bound, bound)
    x = jax.random.normal(k_x, (B, in_f), jnp.float32)

    H = jnp.asarray(create_harmonic_matrix(in_f, sample_rate, n_mels))
    M = jnp.asarray(create_masking_matrix(in_f, n_mels, True))
    hw = jnp.float32(0.5)

    # --- f32 path vs the literal (unfolded) module semantics ---------------
    params_f32 = precompute_harmonic_params(weight, bias, H, M, hw,
                                            compute_dtype=jnp.float32)
    out_f32 = jax.block_until_ready(harmonic_layer_apply(x, *params_f32))
    wt = weight.T
    ref = (x @ wt + bias + hw * (x @ (H @ wt))) * (1.0 - 0.2 * (jnp.abs(x) @ M))
    np.testing.assert_allclose(np.asarray(out_f32), np.asarray(ref),
                               rtol=2e-3, atol=2e-3)

    # --- default bf16-operand path vs matching-compute reference -----------
    params_bf = precompute_harmonic_params(weight, bias, H, M, hw)  # bf16 default
    out_bf16 = jax.block_until_ready(harmonic_layer_apply(x, *params_bf))
    w_eff_bf, m_bf, b2 = params_bf
    xb = x.astype(jnp.bfloat16)
    ref_bf16 = ((jnp.dot(xb, w_eff_bf, preferred_element_type=jnp.float32) + b2)
                * (1.0 - jnp.dot(jnp.abs(xb), m_bf,
                                 preferred_element_type=jnp.float32)))
    np.testing.assert_allclose(np.asarray(out_bf16), np.asarray(ref_bf16),
                               rtol=2e-2, atol=2e-2)

    # --- exercise the K-tiled (3-D grid, accumulator) path ------------------
    B2, F2 = 16, 256
    k1, k2, k3, k4 = jax.random.split(jax.random.PRNGKey(0), 4)
    x2 = jax.random.normal(k1, (B2, F2), jnp.float32)
    w2 = jax.random.uniform(k2, (F2, F2), jnp.float32, -0.1, 0.1)   # W_eff-like
    m2 = jax.random.uniform(k3, (F2, F2), jnp.float32, 0.0, 0.2)    # M_scaled-like
    b2r = jax.random.uniform(k4, (1, F2), jnp.float32, -0.1, 0.1)
    out_kt = jax.block_until_ready(
        harmonic_layer_apply(x2, w2, m2, b2r, bm=8, bn=128, bk=128))
    ref_kt = (x2 @ w2 + b2r) * (1.0 - jnp.abs(x2) @ m2)
    np.testing.assert_allclose(np.asarray(out_kt), np.asarray(ref_kt),
                               rtol=5e-3, atol=5e-3)

    print("KERNEL_OK")
</pallas_src>

<mosaic_0001>
module attributes {stable_mosaic.version = 11 : i64} {
  func.func @_harmonic_kernel(%arg0: i32, %arg1: i32, %arg2: memref<8x128xf32, #tpu.memory_space<vmem>>, %arg3: memref<128x128xf32, #tpu.memory_space<vmem>>, %arg4: memref<128x128xf32, #tpu.memory_space<vmem>>, %arg5: memref<1x128xf32, #tpu.memory_space<vmem>>, %arg6: memref<8x128xf32, #tpu.memory_space<vmem>>) attributes {dimension_semantics = [#tpu.dimension_semantics<parallel>, #tpu.dimension_semantics<parallel>], iteration_bounds = array<i64: 1, 1>, scalar_prefetch = 0 : i64, scratch_operands = 0 : i64, tpu.core_type = #tpu.core_type<tc>, window_params = [{transform_indices = @transform_0, window_bounds = array<i64: 8, 128>}, {transform_indices = @transform_1, window_bounds = array<i64: 128, 128>}, {transform_indices = @transform_2, window_bounds = array<i64: 128, 128>}, {transform_indices = @transform_3, window_bounds = array<i64: 1, 128>}, {transform_indices = @transform_4, window_bounds = array<i64: 8, 128>}]} {
    %c0 = arith.constant 0 : index
    %c0_0 = arith.constant 0 : index
    %0 = vector.load %arg2[%c0, %c0_0] : memref<8x128xf32, #tpu.memory_space<vmem>>, vector<8x128xf32>
    %c0_1 = arith.constant 0 : index
    %c0_2 = arith.constant 0 : index
    %1 = vector.load %arg3[%c0_1, %c0_2] : memref<128x128xf32, #tpu.memory_space<vmem>>, vector<128x128xf32>
    %cst = arith.constant dense<0.000000e+00> : vector<8x128xf32>
    %2 = tpu.matmul %0, %1, %cst {dimension_numbers = #tpu.dot_dimension_numbers<[1], [0], [0], [1], [0, 0, 1, 1], [], []>} : vector<8x128xf32>, vector<128x128xf32>, vector<8x128xf32> -> vector<8x128xf32>
    %c0_3 = arith.constant 0 : index
    %c0_4 = arith.constant 0 : index
    %3 = vector.load %arg5[%c0_3, %c0_4] : memref<1x128xf32, #tpu.memory_space<vmem>>, vector<1x128xf32>
    %4 = vector.broadcast %3 : vector<1x128xf32> to vector<8x128xf32>
    %5 = arith.addf %2, %4 : vector<8x128xf32>
    %6 = math.absf %0 : vector<8x128xf32>
    %c0_5 = arith.constant 0 : index
    %c0_6 = arith.constant 0 : index
    %7 = vector.load %arg4[%c0_5, %c0_6] : memref<128x128xf32, #tpu.memory_space<vmem>>, vector<128x128xf32>
    %cst_7 = arith.constant dense<0.000000e+00> : vector<8x128xf32>
    %8 = tpu.matmul %6, %7, %cst_7 {dimension_numbers = #tpu.dot_dimension_numbers<[1], [0], [0], [1], [0, 0, 1, 1], [], []>} : vector<8x128xf32>, vector<128x128xf32>, vector<8x128xf32> -> vector<8x128xf32>
    %cst_8 = arith.constant 1.000000e+00 : f32
    %9 = vector.broadcast %cst_8 : f32 to vector<8x128xf32>
    %10 = arith.subf %9, %8 : vector<8x128xf32>
    %11 = arith.mulf %5, %10 : vector<8x128xf32>
    %c0_9 = arith.constant 0 : index
    %c0_10 = arith.constant 0 : index
    %12 = vector.load %arg6[%c0_9, %c0_10] : memref<8x128xf32, #tpu.memory_space<vmem>>, vector<8x128xf32>
    tpu.vector_store %arg6[%c0_9, %c0_10], %11 {strides = array<i32>} : memref<8x128xf32, #tpu.memory_space<vmem>>, vector<8x128xf32>,
    return
  }
  func.func @transform_0(%arg0: i32, %arg1: i32) -> (i32, i32) {
    %c0_i32 = arith.constant 0 : i32
    %c0_i32_0 = arith.constant 0 : i32
    return %arg1, %c0_i32 : i32, i32
  }
  func.func @transform_1(%arg0: i32, %arg1: i32) -> (i32, i32) {
    %c0_i32 = arith.constant 0 : i32
    %c0_i32_0 = arith.constant 0 : i32
    return %c0_i32, %arg0 : i32, i32
  }
  func.func @transform_2(%arg0: i32, %arg1: i32) -> (i32, i32) {
    %c0_i32 = arith.constant 0 : i32
    %c0_i32_0 = arith.constant 0 : i32
    return %c0_i32, %arg0 : i32, i32
  }
  func.func @transform_3(%arg0: i32, %arg1: i32) -> (i32, i32) {
    %c0_i32 = arith.constant 0 : i32
    %c0_i32_0 = arith.constant 0 : i32
    return %c0_i32, %arg0 : i32, i32
  }
  func.func @transform_4(%arg0: i32, %arg1: i32) -> (i32, i32) {
    %c0_i32 = arith.constant 0 : i32
    return %arg1, %arg0 : i32, i32
  }
}

</mosaic_0001>

<bundles_post_ra>
// kernel: tpu_custom_call.1
= control target key start
LH: loop header
LB: loop body
LE: loop exit
PB: predicated region body
PF: predicated region fallthrough
CT: control target
= control target key end

     0   :  { %9 = vsyncpa [#allocation3], 0  ;;  %s317_s0 = inlined_call_operand.hbm [shape: f32[8,128], index: 0, kind: input, shape index: {}]   ;;  %s318_s1 = inlined_call_operand.hbm [shape: f32[128,128], index: 1, kind: input, shape index: {}]   ;;  %s319_s2 = inlined_call_operand.hbm [shape: f32[128,128], index: 2, kind: input, shape index: {}]   ;;  %s320_s3 = inlined_call_operand.vmem [shape: f32[1,128], index: 3, kind: input, shape index: {}]   ;;  %s321_s4 = inlined_call_operand.hbm [shape: f32[8,128], index: 4, kind: output, shape index: {}]  }
   0x1   :  { %10 = vsyncpa [#allocation6], 0  ;;  %s27_s17 = sshll.u32 %s318_s1, 4  ;;  %s28_s17 = int_to_ptr.hbm [resolvable:$true] %s27_s17 }
   0x2   :  { %11 = vsyncpa [#allocation4], 0  ;;  %s271_s18 = smov [#allocation5]   ;;  %s17_s22 = sshll.u32 %s317_s0, 4  ;;  %s18_s22 = int_to_ptr.hbm [resolvable:$true] %s17_s22 }
   0x3   :  { %s29_s19 = sshll.u32 %s271_s18, 4  ;;  %s272_s23 = smov 128   ;;  %s30_s19 = int_to_ptr.vmem [resolvable:$true] %s29_s19 }
   0x4   :  { %s273_s24 = smov 8   ;;  %s274_s25 = smov [#allocation2]  }
   0x5   :  { %35 = dma.hbm_to_vmem [thread:$0]  %s28_s17, 2048, %s30_s19, [#allocation6], %s272_s23, %s272_s23, %s273_s24  }
   0x6   :  { %s19_s26 = sshll.u32 %s274_s25, 4  ;;  %s40_s29 = sshll.u32 %s319_s2, 4  ;;  %s20_s26 = int_to_ptr.vmem [resolvable:$true] %s19_s26  ;;  %s41_s29 = int_to_ptr.hbm [resolvable:$true] %s40_s29 }
   0x7   :  { %22 = dma.hbm_to_vmem [thread:$0]  %s18_s22, 128, %s20_s26, [#allocation3]  }
   0x8   :  { %s275_s1 = smov [#allocation7]  }
   0x9   :  { %s42_s30 = sshll.u32 %s275_s1, 4  ;;  %s43_s30 = int_to_ptr.vmem [resolvable:$true] %s42_s30 }
   0xa   :  { %48 = dma.hbm_to_vmem [thread:$0]  %s41_s29, 2048, %s43_s30, [#allocation6], %s272_s23, %s272_s23, %s273_s24  }
   0xb   :  { %265 = dma.done.wait [#allocation3], 128  }
   0xc   :  { %266 = vsyncadd [#allocation3], 4294967168 }
   0xd   :  { %267 = dma.done.wait [#allocation6], 4096  }
   0xe   :  { %268 = vsyncadd [#allocation6], 4294963200  ;;  %v79_v0 = vld [vmem:[#allocation5 + $0x78] sm:$0xff]  ;;  %v78_v2 = vld [vmem:[#allocation5 + $0x70] sm:$0xff]  ;;  %s276_s5 = smov [#allocation8]   ;;  %s151_s9 = sshll.u32 %s321_s4, 4  ;;  %s152_s9 = int_to_ptr.hbm [resolvable:$true] %s151_s9 }
   0xf   :  { %v120_v1 = vld [vmem:[#allocation7 + $0x78] sm:$0xff]  ;;  %84 = vmatpush.msra.mxu0 %v79_v0  ;;  %v119_v3 = vld [vmem:[#allocation7 + $0x70] sm:$0xff]  ;;  %v77_v4 = vld [vmem:[#allocation5 + $0x68] sm:$0xff]  ;;  %s149_s6 = sshll.u32 %s276_s5, 4  ;;  %s150_s6 = int_to_ptr.vmem [resolvable:$true] %s149_s6 }
  0x10   :  { %121 = vmatpush.msra.mxu1 %v120_v1  ;;  %v118_v5 = vld [vmem:[#allocation7 + $0x68] sm:$0xff]  ;;  %v76_v6 = vld [vmem:[#allocation5 + $0x60] sm:$0xff]  ;;  %v75_v8 = vld [vmem:[#allocation5 + $0x58] sm:$0xff] }
  0x11   :  { %85 = vmatpush.msra.mxu0 %v78_v2  ;;  %v117_v7 = vld [vmem:[#allocation7 + $0x60] sm:$0xff]  ;;  %v116_v9 = vld [vmem:[#allocation7 + $0x58] sm:$0xff]  ;;  %v74_v10 = vld [vmem:[#allocation5 + $0x50] sm:$0xff] }
  0x12   :  { %122 = vmatpush.msra.mxu1 %v119_v3  ;;  %v115_v11 = vld [vmem:[#allocation7 + $0x50] sm:$0xff]  ;;  %v73_v12 = vld [vmem:[#allocation5 + $0x48] sm:$0xff]  ;;  %v72_v14 = vld [vmem:[#allocation5 + $0x40] sm:$0xff] }
  0x13   :  { %86 = vmatpush.msra.mxu0 %v77_v4  ;;  %v114_v13 = vld [vmem:[#allocation7 + $0x48] sm:$0xff]  ;;  %v113_v15 = vld [vmem:[#allocation7 + $0x40] sm:$0xff]  ;;  %v71_v16 = vld [vmem:[#allocation5 + $0x38] sm:$0xff] }
  0x14   :  { %123 = vmatpush.msra.mxu1 %v118_v5  ;;  %v112_v17 = vld [vmem:[#allocation7 + $0x38] sm:$0xff]  ;;  %v70_v18 = vld [vmem:[#allocation5 + $0x30] sm:$0xff]  ;;  %v69_v20 = vld [vmem:[#allocation5 + $0x28] sm:$0xff] }
  0x15   :  { %87 = vmatpush.msra.mxu0 %v76_v6  ;;  %v111_v19 = vld [vmem:[#allocation7 + $0x30] sm:$0xff]  ;;  %v110_v21 = vld [vmem:[#allocation7 + $0x28] sm:$0xff]  ;;  %v68_v22 = vld [vmem:[#allocation5 + $0x20] sm:$0xff] }
  0x16   :  { %124 = vmatpush.msra.mxu1 %v117_v7  ;;  %v109_v23 = vld [vmem:[#allocation7 + $0x20] sm:$0xff]  ;;  %v67_v24 = vld [vmem:[#allocation5 + $0x18] sm:$0xff]  ;;  %v66_v26 = vld [vmem:[#allocation5 + $0x10] sm:$0xff] }
  0x17   :  { %88 = vmatpush.msra.mxu0 %v75_v8  ;;  %v108_v25 = vld [vmem:[#allocation7 + $0x18] sm:$0xff]  ;;  %v107_v27 = vld [vmem:[#allocation7 + $0x10] sm:$0xff]  ;;  %v65_v29 = vld [vmem:[#allocation5 + $0x8] sm:$0xff] }
  0x18   :  { %125 = vmatpush.msra.mxu1 %v116_v9  ;;  %v63_v28 = vld [vmem:[#allocation2] sm:$0xff]  ;;  %v106_v30 = vld [vmem:[#allocation7 + $0x8] sm:$0xff]  ;;  %v64_v31 = vld [vmem:[#allocation5] sm:$0xff] }
  0x19   :  { %89 = vmatpush.msra.mxu0 %v74_v10  ;;  %v105_v32 = vld [vmem:[#allocation7] sm:$0xff]  ;;  %v104_v33 = vand.u32 2147483647, %v63_v28  ;;  %v168_v34 = vld [vmem:[%s320_s3] ss:$0 sm:$0xff] }
  0x1a   :  { %126 = vmatpush.msra.mxu1 %v115_v11 }
  0x1b   :  { %90 = vmatpush.msra.mxu0 %v73_v12 }
  0x1c   :  { %127 = vmatpush.msra.mxu1 %v114_v13 }
  0x1d   :  { %91 = vmatpush.msra.mxu0 %v72_v14 }
  0x1e   :  { %128 = vmatpush.msra.mxu1 %v113_v15 }
  0x1f   :  { %92 = vmatpush.msra.mxu0 %v71_v16 }
  0x20   :  { %129 = vmatpush.msra.mxu1 %v112_v17 }
  0x21   :  { %93 = vmatpush.msra.mxu0 %v70_v18 }
  0x22   :  { %130 = vmatpush.msra.mxu1 %v111_v19 }
  0x23   :  { %94 = vmatpush.msra.mxu0 %v69_v20 }
  0x24   :  { %131 = vmatpush.msra.mxu1 %v110_v21 }
  0x25   :  { %95 = vmatpush.msra.mxu0 %v68_v22 }
  0x26   :  { %132 = vmatpush.msra.mxu1 %v109_v23 }
  0x27   :  { %96 = vmatpush.msra.mxu0 %v67_v24 }
  0x28   :  { %133 = vmatpush.msra.mxu1 %v108_v25 }
  0x29   :  { %97 = vmatpush.msra.mxu0 %v66_v26 }
  0x2a   :  { %134 = vmatpush.msra.mxu1 %v107_v27 }
  0x2b   :  { %98 = vmatpush.msra.mxu0 %v65_v29 }
  0x2c   :  { %135 = vmatpush.msra.mxu1 %v106_v30 }
  0x2d   :  { %99 = vmatpush.msra.mxu0 %v64_v31 }
  0x2e   :  { %136 = vmatpush.msra.mxu1 %v105_v32  ;;  %100 = vmatmul.f32.vlgmr.msra.gmra.mxu0 %v63_v28 }
  0x2f   :  { %137 = vmatmul.f32.vlgmr.msra.gmra.mxu1 %v104_v33 }
  0xab   :  { %v101_v35 = vpop.f32.mrf.mxu0 }
  0xac   :  { %v138_v36 = vpop.f32.mrf.mxu1  ;;  %v102_v37 = vadd.f32 %v168_v34, %v101_v35 }
  0xad   :  { %v141_v38 = vsub.f32 1.0, %v138_v36 }
  0xaf   :  { %v142_v39 = vmul.f32 %v141_v38, %v102_v37 }
  0xb1   :  { %143 = vst [vmem:[#allocation8] sm:$0xff] %v142_v39 }
  0xb2   :  { %154 = dma.vmem_to_hbm [thread:$0]  %s150_s6, 128, %s152_s9, [#allocation4]  }
  0xb3   :  { %269 = dma.done.wait [#allocation4], 128  }
  0xb4   :  { %270 = vsyncadd [#allocation4], 4294967168 }
  0xb5   :  { %159 = vsyncpa [#allocation3], 1 }
  0xb6   :  { %160 = vsyncpa [#allocation6], 1 }
  0xb7   :  { %161 = vsyncpa [#allocation4], 1 }

</bundles_post_ra>
